<compile_context>
chip_gen: v7x
topology: tpu7x:2x2x1
jax: 0.10.0
libtpu: 0.0.40
codegen_flags: <defaults>
</compile_context>

<pallas_src>
import functools

import jax
import jax.numpy as jnp
from jax.experimental import pallas as pl
from jax.experimental.pallas import tpu as pltpu


# ------------------------------ helpers -------------------------------------

def _round_up(x, m):
    return (x + m - 1) // m * m


def _pick_tile(dim, pref, align):
    """Pad `dim` to a multiple of `align`, pick tile=min(pref, padded), re-pad."""
    dp = _round_up(max(dim, 1), align)
    t = min(pref, dp)            # pref is a multiple of align -> t is too
    dp = _round_up(dp, t)
    return dp, t


def _pad2d(x, rows, cols):
    r, c = x.shape
    if r == rows and c == cols:
        return x
    return jnp.pad(x, ((0, rows - r), (0, cols - c)))


def _chip_config():
    """Per-generation tile preferences + VMEM ceiling (review items)."""
    kind = ""
    try:
        kind = jax.devices()[0].device_kind.lower()
    except Exception:
        pass
    if ("v5 lite" in kind) or ("v5e" in kind) or ("v5lite" in kind):
        # v5e: 128-row MXU passes, 16 MiB scoped default, lowest HBM BW.
        return dict(tm=128, tm_proj=256, tn=512, tk=512, tv=1024,
                    vmem_limit=100 * 2**20)
    if "v7" in kind:
        # v7x: 64 MiB physical VMEM per TC -> smaller ceiling & vocab tile.
        return dict(tm=256, tm_proj=512, tn=512, tk=512, tv=1024,
                    vmem_limit=50 * 2**20)
    # v6e / default
    return dict(tm=256, tm_proj=512, tn=512, tk=1024, tv=2048,
                vmem_limit=100 * 2**20)


# ----------------------------- Pallas kernels -------------------------------

def _linear_kernel(x_ref, w_ref, b_ref, o_ref, acc_ref, *, activation):
    """o = act(x @ W + b); grid (M, N, K), K innermost, f32 VMEM accumulator."""
    k = pl.program_id(2)

    @pl.when(k == 0)
    def _():
        acc_ref[...] = jnp.zeros_like(acc_ref)

    acc_ref[...] += jnp.dot(x_ref[...], w_ref[...],
                            preferred_element_type=jnp.float32)

    @pl.when(k == pl.num_programs(2) - 1)
    def _():
        r = acc_ref[...] + b_ref[...]
        if activation == "tanh":
            r = jnp.tanh(r)
        o_ref[...] = r.astype(o_ref.dtype)


def _encoder_mask_kernel(f_ref, w_ref, b_ref, o_ref, mask_ref, acc_ref, rsum_ref):
    """Fused automask (exact f32 row-sum == 0) + tanh(x @ W + b).

    Grid (M, N, K), K innermost.  feats are read once in f32 (exact torch
    .eq(0) semantics) and cast to bf16 only for the MXU.  The row-sum is only
    accumulated on the j==0 pass so it equals the exact sum over the full D.
    """
    j = pl.program_id(1)
    k = pl.program_id(2)
    k_last = pl.num_programs(2) - 1

    @pl.when(k == 0)
    def _():
        acc_ref[...] = jnp.zeros_like(acc_ref)

    @pl.when((j == 0) & (k == 0))
    def _():
        rsum_ref[...] = jnp.zeros_like(rsum_ref)

    f = f_ref[...]                                             # (TM, TK) f32

    @pl.when(j == 0)
    def _():
        rsum_ref[...] += jnp.sum(f, axis=-1, keepdims=True)

    acc_ref[...] += jnp.dot(f.astype(jnp.bfloat16), w_ref[...],
                            preferred_element_type=jnp.float32)

    @pl.when(k == k_last)
    def _():
        o_ref[...] = jnp.tanh(acc_ref[...] + b_ref[...]).astype(o_ref.dtype)

    @pl.when((j == 0) & (k == k_last))
    def _():
        # TODO(synk): emit the mask as an int8 slab once layout is verified;
        # int32 x 128 lanes kept for guaranteed lane-dense unmasked stores.
        mask_ref[...] = jnp.broadcast_to(
            (rsum_ref[...] == 0.0).astype(jnp.int32), mask_ref.shape)


def _proj_logits_lse_kernel(h_ref, w_ref, b_ref, logits_ref, lse_ref,
                            m_scr, l_scr):
    """Vocab-tiled projection with online (flash-style) logsumexp.

    Grid = (M_tiles, V_tiles), V innermost / 'arbitrary'.  Emits *bf16* logits
    per (i, j) tile (halves the HBM round-trip of the intermediate) and a
    lane-dense f32 per-row lse (written on the last V tile).  The lse itself is
    computed from the f32 MXU accumulator, so it is exact in f32.
    """
    j = pl.program_id(1)

    @pl.when(j == 0)
    def _():
        m_scr[...] = jnp.full_like(m_scr, -1e30)
        l_scr[...] = jnp.zeros_like(l_scr)

    logits = jnp.dot(h_ref[...], w_ref[...],
                     preferred_element_type=jnp.float32) + b_ref[...]
    logits_ref[...] = logits.astype(logits_ref.dtype)          # bf16 store

    m_prev = m_scr[...]
    m_new = jnp.maximum(m_prev, jnp.max(logits, axis=-1, keepdims=True))
    alpha = jnp.exp(m_prev - m_new)
    l_scr[...] = alpha * l_scr[...] + jnp.sum(jnp.exp(logits - m_new),
                                              axis=-1, keepdims=True)
    m_scr[...] = m_new

    @pl.when(j == pl.num_programs(1) - 1)
    def _():
        lse_ref[...] = jnp.broadcast_to(m_scr[...] + jnp.log(l_scr[...]),
                                        lse_ref.shape)


def _sub_lse_kernel(logits_ref, lse_ref, o_ref):
    """log_softmax finalize: logprobs = f32(bf16 logits) - f32 lse."""
    o_ref[...] = logits_ref[...].astype(jnp.float32) - lse_ref[:, 0:1]


# ----------------------------- Pallas wrappers ------------------------------

def pallas_linear(x2d, w, b, *, activation=None, out_dtype=jnp.float32, cfg=None):
    cfg = cfg or _chip_config()
    M, K = x2d.shape
    _, N = w.shape
    Mp, TM = _pick_tile(M, cfg["tm"], 16)
    Kp, TK = _pick_tile(K, cfg["tk"], 128)
    Np, TN = _pick_tile(N, cfg["tn"], 128)

    x_p = _pad2d(x2d, Mp, Kp).astype(jnp.bfloat16)
    w_p = _pad2d(w, Kp, Np).astype(jnp.bfloat16)
    b_p = _pad2d(b.reshape(1, -1), 1, Np).astype(jnp.float32)

    grid = (Mp // TM, Np // TN, Kp // TK)
    kern = functools.partial(_linear_kernel, activation=activation)
    out_bytes = Mp * Np * jnp.dtype(out_dtype).itemsize
    cost = pl.CostEstimate(
        flops=2 * Mp * Kp * Np,
        transcendentals=(Mp * Np) if activation == "tanh" else 0,
        bytes_accessed=(x_p.size * 2 * (Np // TN)
                        + w_p.size * 2 * (Mp // TM)
                        + b_p.size * 4 + out_bytes))

    out = pl.pallas_call(
        kern,
        out_shape=jax.ShapeDtypeStruct((Mp, Np), out_dtype),
        grid=grid,
        in_specs=[pl.BlockSpec((TM, TK), lambda i, j, k: (i, k)),
                  pl.BlockSpec((TK, TN), lambda i, j, k: (k, j)),
                  pl.BlockSpec((1, TN), lambda i, j, k: (0, j))],
        out_specs=pl.BlockSpec((TM, TN), lambda i, j, k: (i, j)),
        scratch_shapes=[pltpu.VMEM((TM, TN), jnp.float32)],
        compiler_params=pltpu.CompilerParams(
            dimension_semantics=("parallel", "parallel", "arbitrary"),
            vmem_limit_bytes=cfg["vmem_limit"]),
        cost_estimate=cost,
    )(x_p, w_p, b_p)
    return out[:M, :N]


def pallas_encoder_fused(feats2d, w, b, *, out_dtype=jnp.float32, cfg=None):
    """Returns (enc_out (M, N) out_dtype, mask (M,) int32). Exact-mask path."""
    cfg = cfg or _chip_config()
    M, D = feats2d.shape
    _, N = w.shape
    Mp, TM = _pick_tile(M, cfg["tm"], 16)
    Kp, TK = _pick_tile(D, cfg["tk"], 128)
    Np, TN = _pick_tile(N, cfg["tn"], 128)

    f_p = _pad2d(feats2d, Mp, Kp)                       # keep f32 (exact mask)
    w_p = _pad2d(w, Kp, Np).astype(jnp.bfloat16)
    b_p = _pad2d(b.reshape(1, -1), 1, Np).astype(jnp.float32)

    grid = (Mp // TM, Np // TN, Kp // TK)
    out_bytes = Mp * Np * jnp.dtype(out_dtype).itemsize
    cost = pl.CostEstimate(
        flops=2 * Mp * Kp * Np,
        transcendentals=Mp * Np,
        bytes_accessed=(f_p.size * 4 * (Np // TN)
                        + w_p.size * 2 * (Mp // TM)
                        + b_p.size * 4 + out_bytes + Mp * 128 * 4))

    out, mask = pl.pallas_call(
        _encoder_mask_kernel,
        out_shape=(jax.ShapeDtypeStruct((Mp, Np), out_dtype),
                   jax.ShapeDtypeStruct((Mp, 128), jnp.int32)),
        grid=grid,
        in_specs=[pl.BlockSpec((TM, TK), lambda i, j, k: (i, k)),
                  pl.BlockSpec((TK, TN), lambda i, j, k: (k, j)),
                  pl.BlockSpec((1, TN), lambda i, j, k: (0, j))],
        out_specs=(pl.BlockSpec((TM, TN), lambda i, j, k: (i, j)),
                   pl.BlockSpec((TM, 128), lambda i, j, k: (i, 0))),
        scratch_shapes=[pltpu.VMEM((TM, TN), jnp.float32),   # matmul accumulator
                        pltpu.VMEM((TM, 1), jnp.float32)],   # exact f32 row-sum
        compiler_params=pltpu.CompilerParams(
            dimension_semantics=("parallel", "parallel", "arbitrary"),
            vmem_limit_bytes=cfg["vmem_limit"]),
        cost_estimate=cost,
    )(f_p, w_p, b_p)
    return out[:M, :N], mask[:M, 0]


def pallas_proj_logsoftmax(h2d, w, b, *, cfg=None):
    """Fused tgt_word_prj + log_softmax, tiled over rows and vocab."""
    cfg = cfg or _chip_config()
    M, K = h2d.shape
    _, V = w.shape
    Mp, TM = _pick_tile(M, cfg["tm_proj"], 16)
    Kp = _round_up(K, 128)
    Vp, TV = _pick_tile(V, cfg["tv"], 128)

    h_p = _pad2d(h2d, Mp, Kp).astype(jnp.bfloat16)
    w_p = _pad2d(w, Kp, Vp).astype(jnp.bfloat16)
    # padded vocab columns get a very negative bias so they vanish in logsumexp
    b_p = jnp.full((1, Vp), -1e30, dtype=jnp.float32)
    b_p = b_p.at[0, :V].set(b.astype(jnp.float32))

    grid = (Mp // TM, Vp // TV)

    # TODO(synk): quantize prj_w to int8 (per-column scale) on v5e/v6e and to
    # fp8-e4m3 on v7x to halve the dominant weight HBM stream.
    # TODO(synk): if profiling shows exposed weight DMA for small K, add
    # pipeline_mode=pl.Buffered(3) to the weight/bias in_specs below.
    cost1 = pl.CostEstimate(
        flops=2 * Mp * Kp * Vp,
        transcendentals=Mp * Vp,
        bytes_accessed=(h_p.size * 2
                        + w_p.size * 2 * (Mp // TM)   # weight streamed per row tile
                        + b_p.size * 4
                        + Mp * Vp * 2 + Mp * 128 * 4))

    logits, lse = pl.pallas_call(
        _proj_logits_lse_kernel,
        out_shape=(jax.ShapeDtypeStruct((Mp, Vp), jnp.bfloat16),
                   jax.ShapeDtypeStruct((Mp, 128), jnp.float32)),
        grid=grid,
        in_specs=[pl.BlockSpec((TM, Kp), lambda i, j: (i, 0)),
                  pl.BlockSpec((Kp, TV), lambda i, j: (0, j)),
                  pl.BlockSpec((1, TV), lambda i, j: (0, j))],
        out_specs=(pl.BlockSpec((TM, TV), lambda i, j: (i, j)),
                   pl.BlockSpec((TM, 128), lambda i, j: (i, 0))),
        scratch_shapes=[pltpu.VMEM((TM, 1), jnp.float32),   # running max
                        pltpu.VMEM((TM, 1), jnp.float32)],  # running sum-exp
        compiler_params=pltpu.CompilerParams(
            dimension_semantics=("parallel", "arbitrary"),
            vmem_limit_bytes=cfg["vmem_limit"]),
        cost_estimate=cost1,
    )(h_p, w_p, b_p)

    # NOTE: input_output_aliases is not applicable here because the bf16 logits
    # buffer and the f32 logprobs output have different dtypes.
    cost2 = pl.CostEstimate(flops=Mp * Vp, transcendentals=0,
                            bytes_accessed=Mp * Vp * 2 + Mp * Vp * 4 + Mp * 128 * 4)
    logprobs = pl.pallas_call(
        _sub_lse_kernel,
        out_shape=jax.ShapeDtypeStruct((Mp, Vp), jnp.float32),
        grid=grid,
        in_specs=[pl.BlockSpec((TM, TV), lambda i, j: (i, j)),
                  pl.BlockSpec((TM, 128), lambda i, j: (i, 0))],
        out_specs=pl.BlockSpec((TM, TV), lambda i, j: (i, j)),
        compiler_params=pltpu.CompilerParams(
            dimension_semantics=("parallel", "parallel"),
            vmem_limit_bytes=cfg["vmem_limit"]),
        cost_estimate=cost2,
    )(logits, lse)
    return logprobs[:M, :V]


# ------------------------------- Seq2Seq model ------------------------------

class Seq2SeqPallas:
    """Mirrors models/seq2seq.py::Seq2Seq.forward_ARFormer with Pallas compute."""

    def __init__(self, opt, params):
        self.opt = opt
        self.p = params
        self.cfg = _chip_config()

    # --- encode() -----------------------------------------------------------
    def encode(self, feats):
        results = {}
        B, T, D = feats.shape
        f2d = feats.reshape(B * T, D)
        # TODO(synk): the real encoder is an external pluggable module; stand-in
        # is a per-timestep Linear+tanh whose matmul runs in Pallas.
        if self.opt.get("automatic_mask", False):
            # exact-mask path: f32 feats read once, mask fused into the matmul
            enc_flat, mask_flat = pallas_encoder_fused(
                f2d, self.p["enc_w"], self.p["enc_b"],
                out_dtype=jnp.float32, cfg=self.cfg)
            results["attention_mask"] = [mask_flat.reshape(B, T).astype(bool)]
        else:
            # no mask requested: cheaper bf16 feats read, no mask output
            enc_flat = pallas_linear(f2d, self.p["enc_w"], self.p["enc_b"],
                                     activation="tanh",
                                     out_dtype=jnp.float32, cfg=self.cfg)
        enc_out = enc_flat.reshape(B, T, -1)
        # TODO(synk): fuse the per-batch mean over T (enc_hidden) into the
        # encoder kernel as a second accumulated output (batch-aligned tiles).
        enc_hidden = jnp.mean(enc_out, axis=1)
        results["enc_output"] = enc_out
        results["enc_hidden"] = enc_hidden
        return results

    # --- prepare_inputs_for_decoder() ---------------------------------------
    def prepare_inputs_for_decoder(self, encoder_outputs, category):
        input_keys_for_decoder = ["enc_output"]
        if self.opt["decoding_type"] == "LSTM":
            input_keys_for_decoder.append("enc_hidden")
        inputs_for_decoder = {"category": category}
        for key in input_keys_for_decoder:
            inputs_for_decoder[key] = encoder_outputs[key]
        if isinstance(inputs_for_decoder["enc_output"], list):
            assert len(inputs_for_decoder["enc_output"]) == 1
            inputs_for_decoder["enc_output"] = inputs_for_decoder["enc_output"][0]
        return inputs_for_decoder

    # --- decoder stand-in ----------------------------------------------------
    def decoder(self, tgt_seq, enc_output, category=None, **kw):
        # TODO(synk): real ARFormer transformer decoder is external; stand-in is
        # token embedding + pooled visual context + Linear(tanh) (matmul in Pallas).
        B, L = tgt_seq.shape
        embs = jnp.take(self.p["emb"], tgt_seq, axis=0)          # (B, L, H)
        ctx = jnp.mean(enc_output, axis=1, keepdims=True)        # (B, 1, H)
        x = (embs + ctx).reshape(B * L, -1)
        hidden = pallas_linear(x, self.p["dec_w"], self.p["dec_b"],
                               activation="tanh", out_dtype=jnp.bfloat16,
                               cfg=self.cfg)
        return hidden.reshape(B, L, -1), embs

    # --- tgt_word_prj + log_softmax (fused, vocab-tiled) ---------------------
    def tgt_word_prj_logsoftmax(self, hidden):
        B, L, H = hidden.shape
        out = pallas_proj_logsoftmax(hidden.reshape(B * L, H),
                                     self.p["prj_w"], self.p["prj_b"],
                                     cfg=self.cfg)
        return out.reshape(B, L, -1)

    # --- forward_ARFormer -----------------------------------------------------
    def forward_ARFormer(self, kwargs):
        feats, tgt_tokens, category = (kwargs.get(k, None)
                                       for k in ["feats", "tgt_tokens", "category"])
        decoding_type = kwargs.get("decoding_type", self.opt["decoding_type"])
        pmlm_flag = decoding_type == "SelfMask"
        if pmlm_flag:
            tgt_tokens = tgt_tokens[:, 1:]
        else:
            tgt_tokens = tgt_tokens[:, :-1]
        results = self.encode(feats)
        inputs_for_decoder = self.prepare_inputs_for_decoder(results, category)
        hidden_states, embs = self.decoder(tgt_seq=tgt_tokens, **inputs_for_decoder)
        if not isinstance(hidden_states, list):
            hidden_states = [hidden_states]
        tgt_word_logprobs = [self.tgt_word_prj_logsoftmax(h) for h in hidden_states]
        # TODO(synk): Constants.mapping['lang'][0] key unknown; using 'lang_logprobs'.
        results["lang_logprobs"] = tgt_word_logprobs
        return results

    def __call__(self, **kwargs):
        func_name = "forward_" + self.opt["decoding_type"]
        return getattr(self, func_name, None)(kwargs)


# ----------------------------------- main -----------------------------------

if __name__ == "__main__":
    B, T, D_FEAT, H, V, L = 2, 8, 32, 32, 128, 9   # tgt len 9 -> 8 after [:, :-1]

    key = jax.random.PRNGKey(0)
    k_feat, k_tok, k_enc, k_dec, k_emb, k_prj = jax.random.split(key, 6)

    feats = jax.random.normal(k_feat, (B, T, D_FEAT), dtype=jnp.float32)
    # zero one frame so the automatic attention mask has something to detect
    feats = feats.at[1, -1, :].set(0.0)
    tgt_tokens = jax.random.randint(k_tok, (B, L), 0, V, dtype=jnp.int32)
    category = jnp.zeros((B,), dtype=jnp.int32)

    params = {
        "enc_w": 0.05 * jax.random.normal(k_enc, (D_FEAT, H), dtype=jnp.float32),
        "enc_b": jnp.zeros((H,), dtype=jnp.float32),
        "dec_w": 0.05 * jax.random.normal(k_dec, (H, H), dtype=jnp.float32),
        "dec_b": jnp.zeros((H,), dtype=jnp.float32),
        "emb":   0.05 * jax.random.normal(k_emb, (V, H), dtype=jnp.float32),
        # tgt_word_prj: nn.Linear(H, V) stored as (H, V) so y = x @ W + b
        "prj_w": 0.05 * jax.random.normal(k_prj, (H, V), dtype=jnp.float32),
        "prj_b": jnp.zeros((V,), dtype=jnp.float32),
    }

    opt = {"decoding_type": "ARFormer", "vocab_size": V,
           "automatic_mask": True, "tie_weights": False}

    model = Seq2SeqPallas(opt, params)
    results = model(feats=feats, tgt_tokens=tgt_tokens, category=category)

    logprobs = results["lang_logprobs"][0]
    jax.block_until_ready(logprobs)

    assert logprobs.shape == (B, L - 1, V)
    # log_softmax rows must sum to ~1 in prob space (bf16 logits intermediate)
    assert bool(jnp.allclose(jnp.sum(jnp.exp(logprobs), axis=-1), 1.0, atol=5e-3))
    # automatic attention mask must match torch semantics: feat.sum(-1).eq(0)
    mask = results["attention_mask"][0]
    assert mask.shape == (B, T)
    assert bool(jnp.array_equal(mask, (feats.sum(-1) == 0)))

    # loose end-to-end check vs a pure f32 JAX reference of the same stand-in graph
    tt = tgt_tokens[:, :-1]
    enc_ref = jnp.tanh(feats.reshape(B * T, D_FEAT) @ params["enc_w"]
                       + params["enc_b"]).reshape(B, T, -1)
    x_ref = (jnp.take(params["emb"], tt, axis=0)
             + jnp.mean(enc_ref, axis=1, keepdims=True)).reshape(B * (L - 1), -1)
    h_ref = jnp.tanh(x_ref @ params["dec_w"] + params["dec_b"])
    lp_ref = jax.nn.log_softmax(h_ref @ params["prj_w"] + params["prj_b"], axis=-1)
    assert bool(jnp.allclose(logprobs.reshape(B * (L - 1), V), lp_ref, atol=5e-2))

    print("KERNEL_OK")
</pallas_src>

<mosaic_0001>
module attributes {stable_mosaic.version = 11 : i64} {
  func.func @_encoder_mask_kernel(%arg0: i32, %arg1: i32, %arg2: i32, %arg3: memref<16x128xf32, #tpu.memory_space<vmem>>, %arg4: memref<128x128xbf16, #tpu.memory_space<vmem>>, %arg5: memref<1x128xf32, #tpu.memory_space<vmem>>, %arg6: memref<16x128xf32, #tpu.memory_space<vmem>>, %arg7: memref<16x128xi32, #tpu.memory_space<vmem>>, %arg8: memref<16x128xf32, #tpu.memory_space<vmem>>, %arg9: memref<16x1xf32, #tpu.memory_space<vmem>>) attributes {dimension_semantics = [#tpu.dimension_semantics<parallel>, #tpu.dimension_semantics<parallel>, #tpu.dimension_semantics<arbitrary>], iteration_bounds = array<i64: 1, 1, 1>, scalar_prefetch = 0 : i64, scratch_operands = 2 : i64, tpu.core_type = #tpu.core_type<tc>, window_params = [{transform_indices = @transform_0, window_bounds = array<i64: 16, 128>}, {transform_indices = @transform_1, window_bounds = array<i64: 128, 128>}, {transform_indices = @transform_2, window_bounds = array<i64: 1, 128>}, {transform_indices = @transform_3, window_bounds = array<i64: 16, 128>}, {transform_indices = @transform_4, window_bounds = array<i64: 16, 128>}]} {
    %c0_i32 = arith.constant 0 : i32
    %0 = arith.cmpi eq, %arg2, %c0_i32 : i32
    %1 = arith.extui %0 : i1 to i32
    %c0_i32_0 = arith.constant 0 : i32
    %2 = arith.cmpi ne, %1, %c0_i32_0 : i32
    scf.if %2 {
      %cst_18 = arith.constant 0.000000e+00 : f32
      %26 = vector.broadcast %cst_18 : f32 to vector<16x128xf32>
      %c0_19 = arith.constant 0 : index
      %c0_20 = arith.constant 0 : index
      %27 = vector.load %arg8[%c0_19, %c0_20] : memref<16x128xf32, #tpu.memory_space<vmem>>, vector<16x128xf32>
      tpu.vector_store %arg8[%c0_19, %c0_20], %26 {strides = array<i32>} : memref<16x128xf32, #tpu.memory_space<vmem>>, vector<16x128xf32>,
    } else {
    }
    %c0_i32_1 = arith.constant 0 : i32
    %3 = arith.cmpi eq, %arg1, %c0_i32_1 : i32
    %c0_i32_2 = arith.constant 0 : i32
    %4 = arith.cmpi eq, %arg2, %c0_i32_2 : i32
    %5 = arith.andi %3, %4 : i1
    %6 = arith.extui %5 : i1 to i32
    %c0_i32_3 = arith.constant 0 : i32
    %7 = arith.cmpi ne, %6, %c0_i32_3 : i32
    scf.if %7 {
      %cst_18 = arith.constant 0.000000e+00 : f32
      %26 = vector.broadcast %cst_18 : f32 to vector<16x1xf32>
      %c0_19 = arith.constant 0 : index
      %c0_20 = arith.constant 0 : index
      %27 = vector.load %arg9[%c0_19, %c0_20] : memref<16x1xf32, #tpu.memory_space<vmem>>, vector<16x1xf32>
      tpu.vector_store %arg9[%c0_19, %c0_20], %26 {strides = array<i32>} : memref<16x1xf32, #tpu.memory_space<vmem>>, vector<16x1xf32>,
    } else {
    }
    %c0 = arith.constant 0 : index
    %c0_4 = arith.constant 0 : index
    %8 = vector.load %arg3[%c0, %c0_4] : memref<16x128xf32, #tpu.memory_space<vmem>>, vector<16x128xf32>
    %c0_i32_5 = arith.constant 0 : i32
    %9 = arith.cmpi eq, %arg1, %c0_i32_5 : i32
    %10 = arith.extui %9 : i1 to i32
    %c0_i32_6 = arith.constant 0 : i32
    %11 = arith.cmpi ne, %10, %c0_i32_6 : i32
    scf.if %11 {
      %c0_18 = arith.constant 0 : index
      %c0_19 = arith.constant 0 : index
      %26 = vector.load %arg9[%c0_18, %c0_19] : memref<16x1xf32, #tpu.memory_space<vmem>>, vector<16x1xf32>
      %cst_20 = arith.constant dense<0.000000e+00> : vector<16xf32>
      %27 = vector.multi_reduction <add>, %8, %cst_20 [1] : vector<16x128xf32> to vector<16xf32>
      %28 = vector.shape_cast %27 : vector<16xf32> to vector<16x1xf32>
      %29 = arith.addf %26, %28 : vector<16x1xf32>
      %c0_21 = arith.constant 0 : index
      %c0_22 = arith.constant 0 : index
      %30 = vector.load %arg9[%c0_21, %c0_22] : memref<16x1xf32, #tpu.memory_space<vmem>>, vector<16x1xf32>
      tpu.vector_store %arg9[%c0_21, %c0_22], %29 {strides = array<i32>} : memref<16x1xf32, #tpu.memory_space<vmem>>, vector<16x1xf32>,
    } else {
    }
    %c0_7 = arith.constant 0 : index
    %c0_8 = arith.constant 0 : index
    %12 = vector.load %arg8[%c0_7, %c0_8] : memref<16x128xf32, #tpu.memory_space<vmem>>, vector<16x128xf32>
    %13 = arith.truncf %8 : vector<16x128xf32> to vector<16x128xbf16>
    %c0_9 = arith.constant 0 : index
    %c0_10 = arith.constant 0 : index
    %14 = vector.load %arg4[%c0_9, %c0_10] : memref<128x128xbf16, #tpu.memory_space<vmem>>, vector<128x128xbf16>
    %cst = arith.constant dense<0.000000e+00> : vector<16x128xf32>
    %15 = tpu.matmul %13, %14, %cst {dimension_numbers = #tpu.dot_dimension_numbers<[1], [0], [0], [1], [0, 0, 1, 1], [], []>} : vector<16x128xbf16>, vector<128x128xbf16>, vector<16x128xf32> -> vector<16x128xf32>
    %16 = arith.addf %12, %15 : vector<16x128xf32>
    %c0_11 = arith.constant 0 : index
    %c0_12 = arith.constant 0 : index
    %17 = vector.load %arg8[%c0_11, %c0_12] : memref<16x128xf32, #tpu.memory_space<vmem>>, vector<16x128xf32>
    tpu.vector_store %arg8[%c0_11, %c0_12], %16 {strides = array<i32>} : memref<16x128xf32, #tpu.memory_space<vmem>>, vector<16x128xf32>,
    %c0_i32_13 = arith.constant 0 : i32
    %18 = arith.cmpi eq, %arg2, %c0_i32_13 : i32
    %19 = arith.extui %18 : i1 to i32
    %c0_i32_14 = arith.constant 0 : i32
    %20 = arith.cmpi ne, %19, %c0_i32_14 : i32
    scf.if %20 {
      %c0_18 = arith.constant 0 : index
      %c0_19 = arith.constant 0 : index
      %26 = vector.load %arg8[%c0_18, %c0_19] : memref<16x128xf32, #tpu.memory_space<vmem>>, vector<16x128xf32>
      %c0_20 = arith.constant 0 : index
      %c0_21 = arith.constant 0 : index
      %27 = vector.load %arg5[%c0_20, %c0_21] : memref<1x128xf32, #tpu.memory_space<vmem>>, vector<1x128xf32>
      %28 = vector.broadcast %27 : vector<1x128xf32> to vector<16x128xf32>
      %29 = arith.addf %26, %28 : vector<16x128xf32>
      %30 = math.tanh %29 : vector<16x128xf32>
      %c0_22 = arith.constant 0 : index
      %c0_23 = arith.constant 0 : index
      %31 = vector.load %arg6[%c0_22, %c0_23] : memref<16x128xf32, #tpu.memory_space<vmem>>, vector<16x128xf32>
      tpu.vector_store %arg6[%c0_22, %c0_23], %30 {strides = array<i32>} : memref<16x128xf32, #tpu.memory_space<vmem>>, vector<16x128xf32>,
    } else {
    }
    %c0_i32_15 = arith.constant 0 : i32
    %21 = arith.cmpi eq, %arg1, %c0_i32_15 : i32
    %c0_i32_16 = arith.constant 0 : i32
    %22 = arith.cmpi eq, %arg2, %c0_i32_16 : i32
    %23 = arith.andi %21, %22 : i1
    %24 = arith.extui %23 : i1 to i32
    %c0_i32_17 = arith.constant 0 : i32
    %25 = arith.cmpi ne, %24, %c0_i32_17 : i32
    scf.if %25 {
      %c0_18 = arith.constant 0 : index
      %c0_19 = arith.constant 0 : index
      %26 = vector.load %arg9[%c0_18, %c0_19] : memref<16x1xf32, #tpu.memory_space<vmem>>, vector<16x1xf32>
      %cst_20 = arith.constant 0.000000e+00 : f32
      %27 = vector.broadcast %cst_20 : f32 to vector<16x1xf32>
      %28 = arith.cmpf oeq, %26, %27 : vector<16x1xf32>
      %29 = arith.extui %28 : vector<16x1xi1> to vector<16x1xi32>
      %30 = vector.shape_cast %29 : vector<16x1xi32> to vector<16x1xi32>
      %31 = vector.broadcast %30 : vector<16x1xi32> to vector<16x128xi32>
      %c0_21 = arith.constant 0 : index
      %c0_22 = arith.constant 0 : index
      %32 = vector.load %arg7[%c0_21, %c0_22] : memref<16x128xi32, #tpu.memory_space<vmem>>, vector<16x128xi32>
      tpu.vector_store %arg7[%c0_21, %c0_22], %31 {strides = array<i32>} : memref<16x128xi32, #tpu.memory_space<vmem>>, vector<16x128xi32>,
    } else {
    }
    return
  }
  func.func @transform_0(%arg0: i32, %arg1: i32, %arg2: i32) -> (i32, i32) {
    %c0_i32 = arith.constant 0 : i32
    return %arg0, %arg2 : i32, i32
  }
  func.func @transform_1(%arg0: i32, %arg1: i32, %arg2: i32) -> (i32, i32) {
    %c0_i32 = arith.constant 0 : i32
    return %arg2, %arg1 : i32, i32
  }
  func.func @transform_2(%arg0: i32, %arg1: i32, %arg2: i32) -> (i32, i32) {
    %c0_i32 = arith.constant 0 : i32
    %c0_i32_0 = arith.constant 0 : i32
    return %c0_i32, %arg1 : i32, i32
  }
  func.func @transform_3(%arg0: i32, %arg1: i32, %arg2: i32) -> (i32, i32) {
    %c0_i32 = arith.constant 0 : i32
    return %arg0, %arg1 : i32, i32
  }
  func.func @transform_4(%arg0: i32, %arg1: i32, %arg2: i32) -> (i32, i32) {
    %c0_i32 = arith.constant 0 : i32
    %c0_i32_0 = arith.constant 0 : i32
    return %arg0, %c0_i32 : i32, i32
  }
}

</mosaic_0001>

<bundles_post_ra>
// kernel: tpu_custom_call.1
= control target key start
LH: loop header
LB: loop body
LE: loop exit
PB: predicated region body
PF: predicated region fallthrough
CT: control target
= control target key end

     0   :  { %10 = vsyncpa [#allocation5], 0  ;;  %s560_s0 = inlined_call_operand.hbm [shape: f32[16,128], index: 0, kind: input, shape index: {}]   ;;  %s561_s1 = inlined_call_operand.hbm [shape: bf16[128,128], index: 1, kind: input, shape index: {}]   ;;  %s562_s2 = inlined_call_operand.hbm [shape: f32[1,128], index: 2, kind: input, shape index: {}]   ;;  %s563_s3 = inlined_call_operand.hbm [shape: f32[16,128], index: 3, kind: output, shape index: {0}]   ;;  %s564_s4 = inlined_call_operand.hbm [shape: s32[16,128], index: 4, kind: output, shape index: {1}]  }
   0x1   :  { %11 = vsyncpa [#allocation8], 0 }
   0x2   :  { %12 = vsyncpa [#allocation6], 0 }
   0x3   :  { %13 = vsyncpa [#allocation12], 0  ;;  %s450_s15 = smov [#allocation7]   ;;  %s332_s19 = scalar_lea.hbm %s561_s1, 1024 }
   0x4   :  { %s31_s16 = sshll.u32 %s450_s15, 4  ;;  %p333_p0 = scmp.ne.s32.totalorder %s561_s1, %s332_s19  ;;  %s32_s16 = int_to_ptr.vmem [resolvable:$true] %s31_s16 }
   0x5   :  { %p336_p1 = scmp.lt.u32.totalorder %s332_s19, %s561_s1 }
   0x7   :  { %p338_p2 = pnand %p336_p1, %p333_p0 }
   0x9   :  { %341 = shalt.err (!%p338_p2)
}
   0xa   :  { %s342_s24 = scalar_lea.vmem %s32_s16, 1024  ;;  %p347_p4 = scmp.lt.s32.totalorder %s32_s16, %s32_s16 }
   0xb   :  { %p343_p3 = scmp.ne.s32.totalorder %s32_s16, %s342_s24  ;;  %p348_p5 = scmp.lt.s32.totalorder %s342_s24, %s342_s24 }
   0xd   :  { %p349_p6 = por %p348_p5, %p347_p4 }
   0xf   :  { %p350_p7 = pnand %p349_p6, %p343_p3 }
  0x11   :  { %353 = shalt.err (!%p350_p7)
}
  0x12   :  { %s451_s25 = smov 64   ;;  %s452_s26 = smov 4  }
  0x13   :  { %37 = dma.hbm_to_vmem [thread:$0]  %s561_s1, 1024, %s32_s16, [#allocation8], %s451_s25, %s451_s25, %s452_s26  }
  0x14   :  { %s453_s29 = smov [#allocation4]   ;;  %s354_s7 = scalar_lea.hbm %s560_s0, 256 }
  0x15   :  { %s19_s30 = sshll.u32 %s453_s29, 4  ;;  %p355_p8 = scmp.ne.s32.totalorder %s560_s0, %s354_s7  ;;  %s20_s30 = int_to_ptr.vmem [resolvable:$true] %s19_s30 }
  0x16   :  { %p358_p9 = scmp.lt.u32.totalorder %s354_s7, %s560_s0 }
  0x18   :  { %p360_p10 = pnand %p358_p9, %p355_p8 }
  0x1a   :  { %363 = shalt.err (!%p360_p10)
}
  0x1b   :  { %s364_s12 = scalar_lea.vmem %s20_s30, 256  ;;  %p369_p12 = scmp.lt.s32.totalorder %s20_s30, %s20_s30 }
  0x1c   :  { %p365_p11 = scmp.ne.s32.totalorder %s20_s30, %s364_s12  ;;  %p370_p13 = scmp.lt.s32.totalorder %s364_s12, %s364_s12 }
  0x1e   :  { %p371_p0 = por %p370_p13, %p369_p12 }
  0x20   :  { %p372_p1 = pnand %p371_p0, %p365_p11 }
  0x22   :  { %375 = shalt.err (!%p372_p1)
}
  0x23   :  { %s454_s1 = smov 128   ;;  %s455_s13 = smov 8  }
  0x24   :  { %25 = dma.hbm_to_vmem [thread:$0]  %s560_s0, 256, %s20_s30, [#allocation5], %s454_s1, %s454_s1, %s455_s13  }
  0x25   :  { %s456_s16 = smov [#allocation9]   ;;  %s376_s20 = scalar_lea.hbm %s562_s2, 16 }
  0x26   :  { %s44_s17 = sshll.u32 %s456_s16, 4  ;;  %p377_p2 = scmp.ne.s32.totalorder %s562_s2, %s376_s20  ;;  %s45_s17 = int_to_ptr.vmem [resolvable:$true] %s44_s17 }
  0x27   :  { %p380_p3 = scmp.lt.u32.totalorder %s376_s20, %s562_s2 }
  0x29   :  { %p382_p4 = pnand %p380_p3, %p377_p2 }
  0x2b   :  { %385 = shalt.err (!%p382_p4)
}
  0x2c   :  { %s386_s25 = scalar_lea.vmem %s45_s17, 16  ;;  %s390_s0 = scalar_lea.vmem %s45_s17, 32 }
  0x2d   :  { %p387_p5 = scmp.ne.s32.totalorder %s45_s17, %s386_s25  ;;  %p391_p6 = scmp.lt.s32.totalorder %s45_s17, %s45_s17 }
  0x2e   :  { %p392_p7 = scmp.lt.s32.totalorder %s390_s0, %s386_s25 }
  0x30   :  { %p393_p8 = por %p392_p7, %p391_p6 }
  0x32   :  { %p394_p9 = pnand %p393_p8, %p387_p5 }
  0x34   :  { %397 = shalt.err (!%p394_p9)
}
  0x35   :  { %47 = dma.hbm_to_vmem [thread:$0]  %s562_s2, 16, %s45_s17, [#allocation8]  }
  0x36   :  { %442 = dma.done.wait [#allocation5], 256  }
  0x37   :  { %443 = vsyncadd [#allocation5], 4294967040 }
  0x38   :  { %444 = dma.done.wait [#allocation8], 1040  }
  0x39   :  { %445 = vsyncadd [#allocation8], 4294966256  ;;  %vm69_vm0 = vcmask 7168   ;;  %v457_v0 = vmov 0.0   ;;  %vm458_vm1 = vmmov 0   ;;  %v72_v1 = vld [vmem:[#allocation4] sm:$0xff] }
  0x3a   :  { %286 = vmatprep.subr.bf16.mxu0 %v457_v0  ;;  %302 = vmatprep.mubr.msk.bf16.mxu0 %vm458_vm1, %v457_v0  ;;  %70 = vst.msk [vmem:[#allocation3] sm:$0xff] %vm69_vm0, %v457_v0  ;;  %71 = vst.msk [vmem:[#allocation3 + $0x8] sm:$0xff] %vm69_vm0, %v457_v0  ;;  %v320_v2 = vld [vmem:[#allocation7] sm:$0xff]   ;;  %v73_v3 = vld [vmem:[#allocation4 + $0x8] sm:$0xff]  ;;  %v459_v9 = vmov 0   ;;  %s460_s2 = smov [#allocation10]  }
  0x3b   :  { %79 = vadd.xlane.f32.xlu0 %v72_v1  ;;  %287 = vmatpush3.bf16.msra.mxu0 %v320_v2  ;;  %v321_v4 = vld [vmem:[#allocation7 + $0x8] sm:$0xff]   ;;  %v322_v5 = vld [vmem:[#allocation7 + $0x10] sm:$0xff]   ;;  %v323_v6 = vld [vmem:[#allocation7 + $0x18] sm:$0xff]   ;;  %v90_v12 = vpack.c.bf16 %v73_v3, %v72_v1  ;;  %s239_s28 = sshll.u32 %s460_s2, 4  ;;  %s240_s28 = int_to_ptr.vmem [resolvable:$true] %s239_s28 }
  0x3c   :  { %288 = vmatprep.subr.bf16.mxu0 %v457_v0  ;;  %v324_v7 = vld [vmem:[#allocation7 + $0x20] sm:$0xff]   ;;  %v325_v8 = vld [vmem:[#allocation7 + $0x28] sm:$0xff]   ;;  %318 = vset.pattern.permute.xlu1 %v459_v9  ;;  %v326_v10 = vld [vmem:[#allocation7 + $0x30] sm:$0xff]   ;;  %s398_s29 = scalar_lea.vmem %s240_s28, 256  ;;  %p403_p11 = scmp.lt.s32.totalorder %s240_s28, %s240_s28 }
  0x3d   :  { %319 = vset.pattern.permute.xlu0 %v459_v9  ;;  %v327_v11 = vld [vmem:[#allocation7 + $0x38] sm:$0xff]   ;;  %v276_v23 = vld [vmem:[#allocation9] ss:$0 sm:$0xff]  ;;  %p399_p10 = scmp.ne.s32.totalorder %s240_s28, %s398_s29  ;;  %p404_p12 = scmp.lt.s32.totalorder %s398_s29, %s398_s29 }
  0x3f   :  { %81 = vadd.xlane.f32.xlu0 %v73_v3  ;;  %289 = vmatpush3.bf16.msra.mxu0 %v321_v4  ;;  %p405_p13 = por %p404_p12, %p403_p11 }
  0x40   :  { %290 = vmatprep.subr.bf16.mxu0 %v457_v0 }
  0x41   :  { %v77_v13 = vld [vmem:[#allocation3] sm:$0xff]  ;;  %v78_v16 = vld [vmem:[#allocation3 + $0x8] sm:$0xff]  ;;  %p406_p0 = pnand %p405_p13, %p399_p10 }
  0x43   :  { %291 = vmatpush3.bf16.msra.mxu0 %v322_v5 }
  0x44   :  { %292 = vmatprep.subr.bf16.mxu0 %v457_v0 }
  0x47   :  { %293 = vmatpush3.bf16.msra.mxu0 %v323_v6 }
  0x48   :  { %294 = vmatprep.subr.bf16.mxu0 %v457_v0 }
  0x4b   :  { %295 = vmatpush3.bf16.msra.mxu0 %v324_v7 }
  0x4c   :  { %296 = vmatprep.subr.bf16.mxu0 %v457_v0 }
  0x4f   :  { %297 = vmatpush3.bf16.msra.mxu0 %v325_v8 }
  0x50   :  { %298 = vmatprep.subr.bf16.mxu0 %v457_v0 }
  0x53   :  { %299 = vmatpush3.bf16.msra.mxu0 %v326_v10 }
  0x54   :  { %300 = vmatprep.subr.bf16.mxu0 %v457_v0 }
  0x57   :  { %301 = vmatpush3.bf16.msra.mxu0 %v327_v11 }
  0x5a   :  { %303 = vmatmul.mubr.bf16.vlgmr.msra.gmra.mrb[0].mxu0 %v90_v12 }
  0xc8   :  { %v80_v14 = vpop.xlane.xlu0 %79 }
  0xc9   :  { %v83_v15 = vadd.f32 %v80_v14, %v77_v13 }
  0xcb   :  { %86 = vst.msk [vmem:[#allocation3] sm:$0xff] %vm69_vm0, %v83_v15 }
  0xcc   :  { %v82_v17 = vpop.xlane.xlu0 %81 }
  0xcd   :  { %v84_v18 = vadd.f32 %v82_v17, %v78_v16 }
  0xcf   :  { %87 = vst.msk [vmem:[#allocation3 + $0x8] sm:$0xff] %vm69_vm0, %v84_v18 }
  0xd2   :  { %v220_v19 = vld [vmem:[#allocation3] sm:$0xff] }
  0xd3   :  { %vm222_vm2 = vcmp.eq.f32.partialorder %v220_v19, 0.0 }
  0xd4   :  { %v224_v20 = vsel %vm222_vm2, 1, %v459_v9 }
  0xd5   :  { %227 = vperm.xlu1 %318, %v224_v20  }
  0xd6   :  { %v221_v21 = vld [vmem:[#allocation3 + $0x8] sm:$0xff] }
  0xd7   :  { %vm223_vm3 = vcmp.eq.f32.partialorder %v221_v21, 0.0 }
  0xd8   :  { %v225_v22 = vsel %vm223_vm3, 1, %v459_v9 }
  0xd9   :  { %230 = vperm.xlu1 %318, %v225_v22  }
 0x12d   :  { %v189_v24 = vpop.f32.mrb[0].mxu0 }
 0x12e   :  { %v212_v25 = vadd.f32 %v276_v23, %v189_v24  ;;  %v304_v26 = vpop.f32.mrb[1].mxu0 }
 0x12f   :  { %v192_v27 = vpop.f32.mrb[2].mxu0 }
 0x130   :  { %328 = vtanh.f32 %v212_v25  ;;  %v213_v28 = vadd.f32 %v276_v23, %v192_v27  ;;  %v305_v29 = vpop.f32.mrb[3].mxu0 }
 0x132   :  { %330 = vtanh.f32 %v213_v28 }
 0x13a   :  { %v329_v30 = vpop.eup %328 }
 0x13b   :  { %216 = vst [vmem:[#allocation10] sm:$0xff] %v329_v30 }
 0x13c   :  { %v331_v31 = vpop.eup %330 }
 0x13d   :  { %217 = vst [vmem:[#allocation10 + $0x8] sm:$0xff] %v331_v31 }
 0x13e   :  { %409 = shalt.err (!%p406_p0)
}
 0x13f   :  { %s410_s6 = scalar_lea.hbm %s563_s3, 256 }
 0x140   :  { %p411_p1 = scmp.ne.s32.totalorder %s563_s3, %s410_s6  ;;  %p414_p2 = scmp.lt.u32.totalorder %s410_s6, %s563_s3 }
 0x142   :  { %p416_p3 = pnand %p414_p2, %p411_p1 }
 0x144   :  { %419 = shalt.err (!%p416_p3)
}
 0x145   :  { %245 = dma.vmem_to_hbm [thread:$0]  %s240_s28, 256, %s563_s3, [#allocation6], %s454_s1, %s454_s1, %s455_s13  }
 0x146   :  { %s461_s14 = smov [#allocation11]  }
 0x147   :  { %s251_s15 = sshll.u32 %s461_s14, 4  ;;  %s252_s15 = int_to_ptr.vmem [resolvable:$true] %s251_s15 }
 0x148   :  { %s420_s16 = scalar_lea.vmem %s252_s15, 256  ;;  %p425_p5 = scmp.lt.s32.totalorder %s252_s15, %s252_s15 }
 0x149   :  { %p421_p4 = scmp.ne.s32.totalorder %s252_s15, %s420_s16  ;;  %p426_p6 = scmp.lt.s32.totalorder %s420_s16, %s420_s16 }
 0x14b   :  { %p427_p7 = por %p426_p6, %p425_p5 }
 0x14d   :  { %p428_p8 = pnand %p427_p7, %p421_p4 }
 0x154   :  { %v228_v32 = vpop.permute.xlu1 %227 }
 0x155   :  { %232 = vst [vmem:[#allocation11] sm:$0xff] %v228_v32 }
 0x158   :  { %v231_v33 = vpop.permute.xlu1 %230 }
 0x159   :  { %233 = vst [vmem:[#allocation11 + $0x8] sm:$0xff] %v231_v33 }
 0x15a   :  { %431 = shalt.err (!%p428_p8)
}
 0x15b   :  { %s432_s19 = scalar_lea.hbm %s564_s4, 256 }
 0x15c   :  { %p433_p9 = scmp.ne.s32.totalorder %s564_s4, %s432_s19  ;;  %p436_p10 = scmp.lt.u32.totalorder %s432_s19, %s564_s4 }
 0x15e   :  { %p438_p11 = pnand %p436_p10, %p433_p9 }
 0x160   :  { %441 = shalt.err (!%p438_p11)
}
 0x161   :  { %257 = dma.vmem_to_hbm [thread:$0]  %s252_s15, 256, %s564_s4, [#allocation12], %s454_s1, %s454_s1, %s455_s13  }
 0x162   :  { %446 = dma.done.wait [#allocation6], 256  }
 0x163   :  { %447 = vsyncadd [#allocation6], 4294967040 }
 0x164   :  { %448 = dma.done.wait [#allocation12], 256  }
 0x165   :  { %449 = vsyncadd [#allocation12], 4294967040 }
 0x166   :  { %264 = vsyncpa [#allocation5], 1 }
 0x167   :  { %265 = vsyncpa [#allocation8], 1 }
 0x168   :  { %266 = vsyncpa [#allocation6], 1 }
 0x169   :  { %267 = vsyncpa [#allocation12], 1 }

</bundles_post_ra>
